<compile_context>
chip_gen: v7x
topology: tpu7x:2x2x1
jax: 0.10.0
libtpu: 0.0.40
codegen_flags: <defaults>
</compile_context>

<pallas_src>
import jax
import jax.numpy as jnp
from jax.experimental import pallas as pl
from jax.experimental.pallas import tpu as pltpu


_SMALL_BYTES = 1 << 20  # below this, a fused XLA elementwise beats any kernel launch


def _residual_scale_kernel(w_ref, x_ref, o_ref):
    # w_ref: (1,) f32 scalar weight in SMEM; x_ref/o_ref: (TM, L) VMEM tiles.
    # Hoist the SMEM scalar load off the store's critical path.
    w = w_ref[0]
    o_ref[...] = (x_ref[...] * w).astype(o_ref.dtype)


def _tpu_params():
    """Generation-aware (tensorcores_per_chip, vmem_limit_bytes, per_buffer_budget_bytes)."""
    try:
        kind = jax.devices()[0].device_kind.lower()
    except Exception:  # pragma: no cover - interpret / no-device fallback
        kind = ""
    if "v7" in kind or "tpu7" in kind:
        # v7x: 2 TCs/chip, 64 MiB VMEM/TC, ~3.2 TB/s HBM -> 8 MiB tiles keep the
        # ~0.35us per-step overhead <10%; in+out double-buffered (~32 MiB) still
        # has headroom under a 48 MiB scoped limit (well below 64 MiB physical).
        return 2, 48 * 1024 * 1024, 8 * 1024 * 1024
    if "v6" in kind or "tpu6" in kind:
        # v6e: single TC, 128 MiB physical VMEM -> big tiles, generous limit.
        return 1, 64 * 1024 * 1024, 8 * 1024 * 1024
    # v5e and anything unrecognized: single TC, conservative budgets.
    return 1, 32 * 1024 * 1024, 4 * 1024 * 1024


def _choose_layout(total, dtype_bytes, n_cores, budget_bytes):
    """Pick (lane width L, kernel rows M, row tile TM) for a flat element count."""
    # Native sublane packing: 8 rows/vreg for 4B dtypes, 16 for 2B, 32 for 1B.
    sub = max(8, 32 // dtype_bytes)

    candidates = (4096, 2048, 1024, 512, 256, 128)
    # Prefer a lane width that divides the element count exactly: the (M, L)
    # re-view is then a zero-copy reshape and there is no ragged tail at all.
    L = None
    for cand in candidates:
        if total % cand == 0 and total // cand >= sub:
            L = cand
            break
    if L is None:
        L = 128
        for cand in candidates:
            if total // cand >= sub:
                L = cand
                break

    M = total // L  # rows handled by the kernel (ragged tail handled by caller)

    # Largest sublane-aligned row tile within the per-buffer VMEM budget.
    budget_rows = max(sub, (budget_bytes // (dtype_bytes * L)) // sub * sub)
    if n_cores >= 2 and M > 2 * sub:
        # Two TensorCores: keep the grid-step count even so both cores stream
        # HBM all the way to the last tile.
        steps = max(2, pl.cdiv(M, budget_rows))
        if steps % 2:
            steps += 1
        TM = min(budget_rows, ((pl.cdiv(M, steps) + sub - 1) // sub) * sub)
        TM = max(TM, sub)
    else:
        # Single TC: the grid is a sequential loop, so take the biggest tile.
        TM = budget_rows
    if TM >= M:
        TM = M  # single full block; full-extent block dims are always layout-legal
    return L, M, TM


def residual_scale(x: jax.Array, weight: jax.Array, *, donate_input: bool = False) -> jax.Array:
    """ResidualScale.forward: x * weight, with weight a shape-(1,) broadcast scalar."""
    w_scalar = weight.reshape(())
    if x.size == 0:
        return x

    dtype_bytes = jnp.dtype(x.dtype).itemsize
    if x.size * dtype_bytes < _SMALL_BYTES:
        # Tiny tensors: fixed pallas_call + per-step overhead dwarfs the work.
        return x * w_scalar.astype(x.dtype)

    n_cores, vmem_limit, budget = _tpu_params()
    total = x.size
    L, M, TM = _choose_layout(total, dtype_bytes, n_cores, budget)

    flat = x.reshape(-1)          # contiguous row-major -> free re-view
    bulk = M * L
    x2 = (flat if bulk == total else flat[:bulk]).reshape(M, L)

    extra = {}
    if donate_input:
        # Reuse x2's HBM buffer for the output (caller must donate x for this to
        # be copy-free; off by default so non-donating callers pay nothing).
        extra["input_output_aliases"] = {1: 0}

    out2 = pl.pallas_call(
        _residual_scale_kernel,
        out_shape=jax.ShapeDtypeStruct((M, L), x.dtype),
        grid_spec=pltpu.PrefetchScalarGridSpec(
            num_scalar_prefetch=0,
            grid=(pl.cdiv(M, TM),),
            in_specs=[
                pl.BlockSpec(memory_space=pltpu.MemorySpace.SMEM),  # (1,) scalar weight
                pl.BlockSpec((TM, L), lambda i: (i, 0)),            # x tile
            ],
            out_specs=pl.BlockSpec((TM, L), lambda i: (i, 0)),
        ),
        # TODO(synk): verify on v7x that "parallel" shards this 1-D grid across both
        # TensorCores; if not, switch to pltpu.CORE_PARALLEL / pl.core_map.
        compiler_params=pltpu.CompilerParams(
            dimension_semantics=("parallel",),
            vmem_limit_bytes=vmem_limit,
        ),
        **extra,
    )(weight.reshape(1).astype(jnp.float32), x2)

    if bulk == total:
        return out2.reshape(x.shape)
    # Ragged tail (< L elements): one-line plain-JAX multiply, then stitch.
    tail_out = flat[bulk:] * w_scalar.astype(x.dtype)
    return jnp.concatenate([out2.reshape(-1), tail_out]).reshape(x.shape)


if __name__ == "__main__":
    key = jax.random.PRNGKey(0)
    # Buffer init matches nn.Module.__init__: ones, shape (1,).
    weight = jnp.ones((1,), dtype=jnp.float32)

    # Small NCHW input consistent with the module (hits the small-tensor fast path).
    x_small = jax.random.normal(key, (2, 4, 16, 16), dtype=jnp.float32)
    y_small = jax.block_until_ready(residual_scale(x_small, weight))
    assert y_small.shape == x_small.shape and y_small.dtype == x_small.dtype
    assert jnp.allclose(y_small, x_small * weight[0])

    # Non-trivial weight + a shape large enough to exercise the Pallas kernel
    # (element count divisible by 128 -> zero-copy reshape path, no tail).
    w2 = jnp.full((1,), 2.5, dtype=jnp.float32)
    x_big = jax.random.normal(jax.random.PRNGKey(0), (4, 8, 96, 96), dtype=jnp.float32)
    y_big = jax.block_until_ready(residual_scale(x_big, w2))
    assert y_big.shape == x_big.shape and jnp.allclose(y_big, x_big * 2.5)

    # Ragged element count (not a multiple of 128) -> bulk kernel + plain-JAX tail.
    x_rag = jax.random.normal(jax.random.PRNGKey(1), (3, 9, 131, 97), dtype=jnp.float32)
    y_rag = jax.block_until_ready(residual_scale(x_rag, w2))
    assert y_rag.shape == x_rag.shape and jnp.allclose(y_rag, x_rag * 2.5)

    # bf16 input exercises dtype-aware sublane tiling (TM rounded to 16).
    x_bf = jax.random.normal(jax.random.PRNGKey(2), (4, 8, 128, 128),
                             dtype=jnp.float32).astype(jnp.bfloat16)
    y_bf = jax.block_until_ready(residual_scale(x_bf, w2))
    assert y_bf.dtype == jnp.bfloat16
    assert jnp.allclose(y_bf.astype(jnp.float32), x_bf.astype(jnp.float32) * 2.5,
                        rtol=1e-2, atol=1e-2)

    print("KERNEL_OK")
</pallas_src>

<mosaic_0001>
module attributes {stable_mosaic.version = 11 : i64} {
  func.func @_residual_scale_kernel(%arg0: i32, %arg1: memref<1xf32, #tpu.memory_space<smem>>, %arg2: memref<72x4096xf32, #tpu.memory_space<vmem>>, %arg3: memref<72x4096xf32, #tpu.memory_space<vmem>>) attributes {dimension_semantics = [#tpu.dimension_semantics<parallel>], iteration_bounds = array<i64: 1>, scalar_prefetch = 0 : i64, scratch_operands = 0 : i64, tpu.core_type = #tpu.core_type<tc>, window_params = [{transform_indices = @transform_0, window_bounds = array<i64: 1>}, {transform_indices = @transform_1, window_bounds = array<i64: 72, 4096>}, {transform_indices = @transform_2, window_bounds = array<i64: 72, 4096>}]} {
    %c0 = arith.constant 0 : index
    %0 = memref.load %arg1[%c0] : memref<1xf32, #tpu.memory_space<smem>>
    %c0_0 = arith.constant 0 : index
    %c0_1 = arith.constant 0 : index
    %1 = vector.load %arg2[%c0_0, %c0_1] : memref<72x4096xf32, #tpu.memory_space<vmem>>, vector<72x4096xf32>
    %2 = vector.broadcast %0 : f32 to vector<72x4096xf32>
    %3 = arith.mulf %1, %2 : vector<72x4096xf32>
    %c0_2 = arith.constant 0 : index
    %c0_3 = arith.constant 0 : index
    %4 = vector.load %arg3[%c0_2, %c0_3] : memref<72x4096xf32, #tpu.memory_space<vmem>>, vector<72x4096xf32>
    tpu.vector_store %arg3[%c0_2, %c0_3], %3 {strides = array<i32>} : memref<72x4096xf32, #tpu.memory_space<vmem>>, vector<72x4096xf32>,
    return
  }
  func.func @transform_0(%arg0: i32) -> i32 {
    %c0_i32 = arith.constant 0 : i32
    %c0_i32_0 = arith.constant 0 : i32
    return %c0_i32 : i32
  }
  func.func @transform_1(%arg0: i32) -> (i32, i32) {
    %c0_i32 = arith.constant 0 : i32
    %c0_i32_0 = arith.constant 0 : i32
    return %arg0, %c0_i32 : i32, i32
  }
  func.func @transform_2(%arg0: i32) -> (i32, i32) {
    %c0_i32 = arith.constant 0 : i32
    %c0_i32_0 = arith.constant 0 : i32
    return %arg0, %c0_i32 : i32, i32
  }
}

</mosaic_0001>

<bundles_post_ra>
// kernel: tpu_custom_call.1
= control target key start
LH: loop header
LB: loop body
LE: loop exit
PB: predicated region body
PF: predicated region fallthrough
CT: control target
= control target key end

     0   :  { %8 = vsyncpa [#allocation4], 0  ;;  %s1304_s0 = inlined_call_operand.<no memory space> [shape: f32[1], index: 0, kind: input, shape index: {}]   ;;  %s1305_s1 = inlined_call_operand.hbm [shape: f32[72,4096], index: 1, kind: input, shape index: {}]   ;;  %s1306_s2 = inlined_call_operand.hbm [shape: f32[72,4096], index: 2, kind: output, shape index: {}]  }
   0x1   :  { %9 = vsyncpa [#allocation5], 0  ;;  %s962_s9 = smov [#allocation3]   ;;  %s914_s13 = scalar_lea.hbm %s1305_s1, 36864 }
   0x2   :  { %s17_s10 = sshll.u32 %s962_s9, 4  ;;  %p915_p0 = scmp.ne.s32.totalorder %s1305_s1, %s914_s13  ;;  %s18_s10 = int_to_ptr.vmem [resolvable:$true] %s17_s10 }
   0x3   :  { %p918_p1 = scmp.lt.u32.totalorder %s914_s13, %s1305_s1 }
   0x5   :  { %p920_p2 = pnand %p918_p1, %p915_p0 }
   0x7   :  { %923 = shalt.err (!%p920_p2)
}
   0x8   :  { %s924_s18 = scalar_lea.vmem %s18_s10, 36864  ;;  %p929_p4 = scmp.lt.s32.totalorder %s18_s10, %s18_s10 }
   0x9   :  { %p925_p3 = scmp.ne.s32.totalorder %s18_s10, %s924_s18  ;;  %p930_p5 = scmp.lt.s32.totalorder %s924_s18, %s924_s18 }
   0xb   :  { %p931_p6 = por %p930_p5, %p929_p4 }
   0xd   :  { %p932_p7 = pnand %p931_p6, %p925_p3 }
   0xf   :  { %935 = shalt.err (!%p932_p7)
}
  0x10   :  { %s963_s19 = smov 4096   ;;  %s964_s20 = smov 256  }
  0x11   :  { %23 = dma.hbm_to_vmem [thread:$0]  %s1305_s1, 36864, %s18_s10, [#allocation4], %s963_s19, %s963_s19, %s964_s20  }
  0x12   :  { %958 = dma.done.wait [#allocation4], 36864  }
  0x13   :  { %959 = vsyncadd [#allocation4], 4294930432  ;;  %v999_v0 = vstv %s1304_s0  ;;  %v28_v1 = vld [vmem:[#allocation3] sm:$0xff]  ;;  %v29_v2 = vld [vmem:[#allocation3 + $0x8] sm:$0xff]  ;;  %s965_s0 = smov [#allocation6]  }
  0x14   :  { %v30_v3 = vld [vmem:[#allocation3 + $0x10] sm:$0xff]  ;;  %v317_v4 = vmul.f32 %v999_v0, %v28_v1  ;;  %v318_v5 = vmul.f32 %v999_v0, %v29_v2  ;;  %v31_v7 = vld [vmem:[#allocation3 + $0x18] sm:$0xff]  ;;  %v32_v8 = vld [vmem:[#allocation3 + $0x20] sm:$0xff]  ;;  %s898_s1 = sshll.u32 %s965_s0, 4  ;;  %s899_s1 = int_to_ptr.vmem [resolvable:$true] %s898_s1 }
  0x15   :  { %v319_v6 = vmul.f32 %v999_v0, %v30_v3  ;;  %v33_v9 = vld [vmem:[#allocation3 + $0x28] sm:$0xff]  ;;  %v320_v10 = vmul.f32 %v999_v0, %v31_v7  ;;  %v321_v11 = vmul.f32 %v999_v0, %v32_v8  ;;  %v34_v13 = vld [vmem:[#allocation3 + $0x30] sm:$0xff]  ;;  %v35_v14 = vld [vmem:[#allocation3 + $0x38] sm:$0xff]  ;;  %s936_s25 = scalar_lea.vmem %s899_s1, 36864  ;;  %p941_p9 = scmp.lt.s32.totalorder %s899_s1, %s899_s1 }
  0x16   :  { %v322_v12 = vmul.f32 %v999_v0, %v33_v9  ;;  %v36_v15 = vld [vmem:[#allocation3 + $0x40] sm:$0xff]  ;;  %605 = vst [vmem:[#allocation6] sm:$0xff] %v317_v4  ;;  %606 = vst [vmem:[#allocation6 + $0x8] sm:$0xff] %v318_v5  ;;  %v323_v16 = vmul.f32 %v999_v0, %v34_v13  ;;  %v324_v17 = vmul.f32 %v999_v0, %v35_v14  ;;  %v37_v19 = vld [vmem:[#allocation3 + $0x48] sm:$0xff]  ;;  %p937_p8 = scmp.ne.s32.totalorder %s899_s1, %s936_s25  ;;  %p942_p10 = scmp.lt.s32.totalorder %s936_s25, %s936_s25 }
  0x17   :  { %607 = vst [vmem:[#allocation6 + $0x10] sm:$0xff] %v319_v6  ;;  %v325_v18 = vmul.f32 %v999_v0, %v36_v15  ;;  %v38_v20 = vld [vmem:[#allocation3 + $0x50] sm:$0xff]  ;;  %v39_v21 = vld [vmem:[#allocation3 + $0x58] sm:$0xff]  ;;  %608 = vst [vmem:[#allocation6 + $0x18] sm:$0xff] %v320_v10  ;;  %v326_v22 = vmul.f32 %v999_v0, %v37_v19 }
  0x18   :  { %609 = vst [vmem:[#allocation6 + $0x20] sm:$0xff] %v321_v11  ;;  %610 = vst [vmem:[#allocation6 + $0x28] sm:$0xff] %v322_v12  ;;  %v327_v23 = vmul.f32 %v999_v0, %v38_v20  ;;  %v328_v24 = vmul.f32 %v999_v0, %v39_v21  ;;  %v40_v25 = vld [vmem:[#allocation3 + $0x60] sm:$0xff]  ;;  %v41_v26 = vld [vmem:[#allocation3 + $0x68] sm:$0xff]  ;;  %p943_p11 = por %p942_p10, %p941_p9 }
  0x19   :  { %v42_v27 = vld [vmem:[#allocation3 + $0x70] sm:$0xff]  ;;  %611 = vst [vmem:[#allocation6 + $0x30] sm:$0xff] %v323_v16  ;;  %612 = vst [vmem:[#allocation6 + $0x38] sm:$0xff] %v324_v17  ;;  %v329_v28 = vmul.f32 %v999_v0, %v40_v25  ;;  %v330_v29 = vmul.f32 %v999_v0, %v41_v26  ;;  %v43_v31 = vld [vmem:[#allocation3 + $0x78] sm:$0xff] }
  0x1a   :  { %613 = vst [vmem:[#allocation6 + $0x40] sm:$0xff] %v325_v18  ;;  %v331_v30 = vmul.f32 %v999_v0, %v42_v27  ;;  %v44_v32 = vld [vmem:[#allocation3 + $0x80] sm:$0xff]  ;;  %v45_v33 = vld [vmem:[#allocation3 + $0x88] sm:$0xff]  ;;  %614 = vst [vmem:[#allocation6 + $0x48] sm:$0xff] %v326_v22  ;;  %v332_v34 = vmul.f32 %v999_v0, %v43_v31  ;;  %p944_p12 = pnand %p943_p11, %p937_p8 }
  0x1b   :  { %615 = vst [vmem:[#allocation6 + $0x50] sm:$0xff] %v327_v23  ;;  %616 = vst [vmem:[#allocation6 + $0x58] sm:$0xff] %v328_v24  ;;  %v333_v35 = vmul.f32 %v999_v0, %v44_v32  ;;  %v334_v36 = vmul.f32 %v999_v0, %v45_v33  ;;  %v46_v37 = vld [vmem:[#allocation3 + $0x90] sm:$0xff]  ;;  %v47_v38 = vld [vmem:[#allocation3 + $0x98] sm:$0xff] }
  0x1c   :  { %v48_v39 = vld [vmem:[#allocation3 + $0xa0] sm:$0xff]  ;;  %617 = vst [vmem:[#allocation6 + $0x60] sm:$0xff] %v329_v28  ;;  %618 = vst [vmem:[#allocation6 + $0x68] sm:$0xff] %v330_v29  ;;  %v335_v40 = vmul.f32 %v999_v0, %v46_v37  ;;  %v336_v41 = vmul.f32 %v999_v0, %v47_v38  ;;  %v49_v43 = vld [vmem:[#allocation3 + $0xa8] sm:$0xff] }
  0x1d   :  { %619 = vst [vmem:[#allocation6 + $0x70] sm:$0xff] %v331_v30  ;;  %v337_v42 = vmul.f32 %v999_v0, %v48_v39  ;;  %v50_v44 = vld [vmem:[#allocation3 + $0xb0] sm:$0xff]  ;;  %v51_v45 = vld [vmem:[#allocation3 + $0xb8] sm:$0xff]  ;;  %620 = vst [vmem:[#allocation6 + $0x78] sm:$0xff] %v332_v34  ;;  %v338_v46 = vmul.f32 %v999_v0, %v49_v43 }
  0x1e   :  { %621 = vst [vmem:[#allocation6 + $0x80] sm:$0xff] %v333_v35  ;;  %622 = vst [vmem:[#allocation6 + $0x88] sm:$0xff] %v334_v36  ;;  %v339_v47 = vmul.f32 %v999_v0, %v50_v44  ;;  %v340_v48 = vmul.f32 %v999_v0, %v51_v45  ;;  %v52_v49 = vld [vmem:[#allocation3 + $0xc0] sm:$0xff]  ;;  %v53_v50 = vld [vmem:[#allocation3 + $0xc8] sm:$0xff] }
  0x1f   :  { %v54_v51 = vld [vmem:[#allocation3 + $0xd0] sm:$0xff]  ;;  %623 = vst [vmem:[#allocation6 + $0x90] sm:$0xff] %v335_v40  ;;  %624 = vst [vmem:[#allocation6 + $0x98] sm:$0xff] %v336_v41  ;;  %v341_v52 = vmul.f32 %v999_v0, %v52_v49  ;;  %v342_v53 = vmul.f32 %v999_v0, %v53_v50  ;;  %v55_v55 = vld [vmem:[#allocation3 + $0xd8] sm:$0xff] }
  0x20   :  { %625 = vst [vmem:[#allocation6 + $0xa0] sm:$0xff] %v337_v42  ;;  %v343_v54 = vmul.f32 %v999_v0, %v54_v51  ;;  %v56_v56 = vld [vmem:[#allocation3 + $0xe0] sm:$0xff]  ;;  %v57_v57 = vld [vmem:[#allocation3 + $0xe8] sm:$0xff]  ;;  %626 = vst [vmem:[#allocation6 + $0xa8] sm:$0xff] %v338_v46  ;;  %v344_v58 = vmul.f32 %v999_v0, %v55_v55 }
  0x21   :  { %627 = vst [vmem:[#allocation6 + $0xb0] sm:$0xff] %v339_v47  ;;  %628 = vst [vmem:[#allocation6 + $0xb8] sm:$0xff] %v340_v48  ;;  %v345_v59 = vmul.f32 %v999_v0, %v56_v56  ;;  %v346_v60 = vmul.f32 %v999_v0, %v57_v57  ;;  %v58_v61 = vld [vmem:[#allocation3 + $0xf0] sm:$0xff]  ;;  %v59_v62 = vld [vmem:[#allocation3 + $0xf8] sm:$0xff] }
  0x22   :  { %v60_v63 = vld [vmem:[#allocation3 + $0x100] sm:$0xff]  ;;  %629 = vst [vmem:[#allocation6 + $0xc0] sm:$0xff] %v341_v52  ;;  %630 = vst [vmem:[#allocation6 + $0xc8] sm:$0xff] %v342_v53  ;;  %v347_v1 = vmul.f32 %v999_v0, %v58_v61  ;;  %v348_v2 = vmul.f32 %v999_v0, %v59_v62  ;;  %v61_v4 = vld [vmem:[#allocation3 + $0x108] sm:$0xff] }
  0x23   :  { %631 = vst [vmem:[#allocation6 + $0xd0] sm:$0xff] %v343_v54  ;;  %v349_v3 = vmul.f32 %v999_v0, %v60_v63  ;;  %v62_v5 = vld [vmem:[#allocation3 + $0x110] sm:$0xff]  ;;  %v63_v6 = vld [vmem:[#allocation3 + $0x118] sm:$0xff]  ;;  %632 = vst [vmem:[#allocation6 + $0xd8] sm:$0xff] %v344_v58  ;;  %v350_v7 = vmul.f32 %v999_v0, %v61_v4 }
  0x24   :  { %633 = vst [vmem:[#allocation6 + $0xe0] sm:$0xff] %v345_v59  ;;  %634 = vst [vmem:[#allocation6 + $0xe8] sm:$0xff] %v346_v60  ;;  %v351_v8 = vmul.f32 %v999_v0, %v62_v5  ;;  %v352_v9 = vmul.f32 %v999_v0, %v63_v6  ;;  %v64_v10 = vld [vmem:[#allocation3 + $0x120] sm:$0xff]  ;;  %v65_v11 = vld [vmem:[#allocation3 + $0x128] sm:$0xff] }
  0x25   :  { %v66_v12 = vld [vmem:[#allocation3 + $0x130] sm:$0xff]  ;;  %635 = vst [vmem:[#allocation6 + $0xf0] sm:$0xff] %v347_v1  ;;  %636 = vst [vmem:[#allocation6 + $0xf8] sm:$0xff] %v348_v2  ;;  %v353_v13 = vmul.f32 %v999_v0, %v64_v10  ;;  %v354_v14 = vmul.f32 %v999_v0, %v65_v11  ;;  %v67_v16 = vld [vmem:[#allocation3 + $0x138] sm:$0xff] }
  0x26   :  { %637 = vst [vmem:[#allocation6 + $0x100] sm:$0xff] %v349_v3  ;;  %v355_v15 = vmul.f32 %v999_v0, %v66_v12  ;;  %v68_v17 = vld [vmem:[#allocation3 + $0x140] sm:$0xff]  ;;  %v69_v18 = vld [vmem:[#allocation3 + $0x148] sm:$0xff]  ;;  %638 = vst [vmem:[#allocation6 + $0x108] sm:$0xff] %v350_v7  ;;  %v356_v19 = vmul.f32 %v999_v0, %v67_v16 }
  0x27   :  { %639 = vst [vmem:[#allocation6 + $0x110] sm:$0xff] %v351_v8  ;;  %640 = vst [vmem:[#allocation6 + $0x118] sm:$0xff] %v352_v9  ;;  %v357_v20 = vmul.f32 %v999_v0, %v68_v17  ;;  %v358_v21 = vmul.f32 %v999_v0, %v69_v18  ;;  %v70_v22 = vld [vmem:[#allocation3 + $0x150] sm:$0xff]  ;;  %v71_v23 = vld [vmem:[#allocation3 + $0x158] sm:$0xff] }
  0x28   :  { %v72_v24 = vld [vmem:[#allocation3 + $0x160] sm:$0xff]  ;;  %641 = vst [vmem:[#allocation6 + $0x120] sm:$0xff] %v353_v13  ;;  %642 = vst [vmem:[#allocation6 + $0x128] sm:$0xff] %v354_v14  ;;  %v359_v25 = vmul.f32 %v999_v0, %v70_v22  ;;  %v360_v26 = vmul.f32 %v999_v0, %v71_v23  ;;  %v73_v28 = vld [vmem:[#allocation3 + $0x168] sm:$0xff] }
  0x29   :  { %643 = vst [vmem:[#allocation6 + $0x130] sm:$0xff] %v355_v15  ;;  %v361_v27 = vmul.f32 %v999_v0, %v72_v24  ;;  %v74_v29 = vld [vmem:[#allocation3 + $0x170] sm:$0xff]  ;;  %v75_v30 = vld [vmem:[#allocation3 + $0x178] sm:$0xff]  ;;  %644 = vst [vmem:[#allocation6 + $0x138] sm:$0xff] %v356_v19  ;;  %v362_v31 = vmul.f32 %v999_v0, %v73_v28 }
  0x2a   :  { %645 = vst [vmem:[#allocation6 + $0x140] sm:$0xff] %v357_v20  ;;  %646 = vst [vmem:[#allocation6 + $0x148] sm:$0xff] %v358_v21  ;;  %v363_v32 = vmul.f32 %v999_v0, %v74_v29  ;;  %v364_v33 = vmul.f32 %v999_v0, %v75_v30  ;;  %v76_v34 = vld [vmem:[#allocation3 + $0x180] sm:$0xff]  ;;  %v77_v35 = vld [vmem:[#allocation3 + $0x188] sm:$0xff] }
  0x2b   :  { %v78_v36 = vld [vmem:[#allocation3 + $0x190] sm:$0xff]  ;;  %647 = vst [vmem:[#allocation6 + $0x150] sm:$0xff] %v359_v25  ;;  %648 = vst [vmem:[#allocation6 + $0x158] sm:$0xff] %v360_v26  ;;  %v365_v37 = vmul.f32 %v999_v0, %v76_v34  ;;  %v366_v38 = vmul.f32 %v999_v0, %v77_v35  ;;  %v79_v40 = vld [vmem:[#allocation3 + $0x198] sm:$0xff] }
  0x2c   :  { %649 = vst [vmem:[#allocation6 + $0x160] sm:$0xff] %v361_v27  ;;  %v367_v39 = vmul.f32 %v999_v0, %v78_v36  ;;  %v80_v41 = vld [vmem:[#allocation3 + $0x1a0] sm:$0xff]  ;;  %v81_v42 = vld [vmem:[#allocation3 + $0x1a8] sm:$0xff]  ;;  %650 = vst [vmem:[#allocation6 + $0x168] sm:$0xff] %v362_v31  ;;  %v368_v43 = vmul.f32 %v999_v0, %v79_v40 }
  0x2d   :  { %651 = vst [vmem:[#allocation6 + $0x170] sm:$0xff] %v363_v32  ;;  %652 = vst [vmem:[#allocation6 + $0x178] sm:$0xff] %v364_v33  ;;  %v369_v44 = vmul.f32 %v999_v0, %v80_v41  ;;  %v370_v45 = vmul.f32 %v999_v0, %v81_v42  ;;  %v82_v46 = vld [vmem:[#allocation3 + $0x1b0] sm:$0xff]  ;;  %v83_v47 = vld [vmem:[#allocation3 + $0x1b8] sm:$0xff] }
  0x2e   :  { %v84_v48 = vld [vmem:[#allocation3 + $0x1c0] sm:$0xff]  ;;  %653 = vst [vmem:[#allocation6 + $0x180] sm:$0xff] %v365_v37  ;;  %654 = vst [vmem:[#allocation6 + $0x188] sm:$0xff] %v366_v38  ;;  %v371_v49 = vmul.f32 %v999_v0, %v82_v46  ;;  %v372_v50 = vmul.f32 %v999_v0, %v83_v47  ;;  %v85_v52 = vld [vmem:[#allocation3 + $0x1c8] sm:$0xff] }
  0x2f   :  { %655 = vst [vmem:[#allocation6 + $0x190] sm:$0xff] %v367_v39  ;;  %v373_v51 = vmul.f32 %v999_v0, %v84_v48  ;;  %v86_v53 = vld [vmem:[#allocation3 + $0x1d0] sm:$0xff]  ;;  %v87_v54 = vld [vmem:[#allocation3 + $0x1d8] sm:$0xff]  ;;  %656 = vst [vmem:[#allocation6 + $0x198] sm:$0xff] %v368_v43  ;;  %v374_v55 = vmul.f32 %v999_v0, %v85_v52 }
  0x30   :  { %657 = vst [vmem:[#allocation6 + $0x1a0] sm:$0xff] %v369_v44  ;;  %658 = vst [vmem:[#allocation6 + $0x1a8] sm:$0xff] %v370_v45  ;;  %v375_v56 = vmul.f32 %v999_v0, %v86_v53  ;;  %v376_v57 = vmul.f32 %v999_v0, %v87_v54  ;;  %v88_v58 = vld [vmem:[#allocation3 + $0x1e0] sm:$0xff]  ;;  %v89_v59 = vld [vmem:[#allocation3 + $0x1e8] sm:$0xff] }
  0x31   :  { %v90_v60 = vld [vmem:[#allocation3 + $0x1f0] sm:$0xff]  ;;  %659 = vst [vmem:[#allocation6 + $0x1b0] sm:$0xff] %v371_v49  ;;  %660 = vst [vmem:[#allocation6 + $0x1b8] sm:$0xff] %v372_v50  ;;  %v377_v61 = vmul.f32 %v999_v0, %v88_v58  ;;  %v378_v62 = vmul.f32 %v999_v0, %v89_v59  ;;  %v91_v1 = vld [vmem:[#allocation3 + $0x1f8] sm:$0xff] }
  0x32   :  { %661 = vst [vmem:[#allocation6 + $0x1c0] sm:$0xff] %v373_v51  ;;  %v379_v63 = vmul.f32 %v999_v0, %v90_v60  ;;  %v92_v2 = vld [vmem:[#allocation3 + $0x200] sm:$0xff]  ;;  %v93_v3 = vld [vmem:[#allocation3 + $0x208] sm:$0xff]  ;;  %662 = vst [vmem:[#allocation6 + $0x1c8] sm:$0xff] %v374_v55  ;;  %v380_v4 = vmul.f32 %v999_v0, %v91_v1 }
  0x33   :  { %663 = vst [vmem:[#allocation6 + $0x1d0] sm:$0xff] %v375_v56  ;;  %664 = vst [vmem:[#allocation6 + $0x1d8] sm:$0xff] %v376_v57  ;;  %v381_v5 = vmul.f32 %v999_v0, %v92_v2  ;;  %v382_v6 = vmul.f32 %v999_v0, %v93_v3  ;;  %v94_v7 = vld [vmem:[#allocation3 + $0x210] sm:$0xff]  ;;  %v95_v8 = vld [vmem:[#allocation3 + $0x218] sm:$0xff] }
  0x34   :  { %v96_v9 = vld [vmem:[#allocation3 + $0x220] sm:$0xff]  ;;  %665 = vst [vmem:[#allocation6 + $0x1e0] sm:$0xff] %v377_v61  ;;  %666 = vst [vmem:[#allocation6 + $0x1e8] sm:$0xff] %v378_v62  ;;  %v383_v10 = vmul.f32 %v999_v0, %v94_v7  ;;  %v384_v11 = vmul.f32 %v999_v0, %v95_v8  ;;  %v97_v13 = vld [vmem:[#allocation3 + $0x228] sm:$0xff] }
  0x35   :  { %667 = vst [vmem:[#allocation6 + $0x1f0] sm:$0xff] %v379_v63  ;;  %v385_v12 = vmul.f32 %v999_v0, %v96_v9  ;;  %v98_v14 = vld [vmem:[#allocation3 + $0x230] sm:$0xff]  ;;  %v99_v15 = vld [vmem:[#allocation3 + $0x238] sm:$0xff]  ;;  %668 = vst [vmem:[#allocation6 + $0x1f8] sm:$0xff] %v380_v4  ;;  %v386_v16 = vmul.f32 %v999_v0, %v97_v13 }
  0x36   :  { %669 = vst [vmem:[#allocation6 + $0x200] sm:$0xff] %v381_v5  ;;  %670 = vst [vmem:[#allocation6 + $0x208] sm:$0xff] %v382_v6  ;;  %v387_v17 = vmul.f32 %v999_v0, %v98_v14  ;;  %v388_v18 = vmul.f32 %v999_v0, %v99_v15  ;;  %v100_v19 = vld [vmem:[#allocation3 + $0x240] sm:$0xff]  ;;  %v101_v20 = vld [vmem:[#allocation3 + $0x248] sm:$0xff] }
  0x37   :  { %v102_v21 = vld [vmem:[#allocation3 + $0x250] sm:$0xff]  ;;  %671 = vst [vmem:[#allocation6 + $0x210] sm:$0xff] %v383_v10  ;;  %672 = vst [vmem:[#allocation6 + $0x218] sm:$0xff] %v384_v11  ;;  %v389_v22 = vmul.f32 %v999_v0, %v100_v19  ;;  %v390_v23 = vmul.f32 %v999_v0, %v101_v20  ;;  %v103_v25 = vld [vmem:[#allocation3 + $0x258] sm:$0xff] }
  0x38   :  { %673 = vst [vmem:[#allocation6 + $0x220] sm:$0xff] %v385_v12  ;;  %v391_v24 = vmul.f32 %v999_v0, %v102_v21  ;;  %v104_v26 = vld [vmem:[#allocation3 + $0x260] sm:$0xff]  ;;  %v105_v27 = vld [vmem:[#allocation3 + $0x268] sm:$0xff]  ;;  %674 = vst [vmem:[#allocation6 + $0x228] sm:$0xff] %v386_v16  ;;  %v392_v28 = vmul.f32 %v999_v0, %v103_v25 }
  0x39   :  { %675 = vst [vmem:[#allocation6 + $0x230] sm:$0xff] %v387_v17  ;;  %676 = vst [vmem:[#allocation6 + $0x238] sm:$0xff] %v388_v18  ;;  %v393_v29 = vmul.f32 %v999_v0, %v104_v26  ;;  %v394_v30 = vmul.f32 %v999_v0, %v105_v27  ;;  %v106_v31 = vld [vmem:[#allocation3 + $0x270] sm:$0xff]  ;;  %v107_v32 = vld [vmem:[#allocation3 + $0x278] sm:$0xff] }
  0x3a   :  { %v108_v33 = vld [vmem:[#allocation3 + $0x280] sm:$0xff]  ;;  %677 = vst [vmem:[#allocation6 + $0x240] sm:$0xff] %v389_v22  ;;  %678 = vst [vmem:[#allocation6 + $0x248] sm:$0xff] %v390_v23  ;;  %v395_v34 = vmul.f32 %v999_v0, %v106_v31  ;;  %v396_v35 = vmul.f32 %v999_v0, %v107_v32  ;;  %v109_v37 = vld [vmem:[#allocation3 + $0x288] sm:$0xff] }
  0x3b   :  { %679 = vst [vmem:[#allocation6 + $0x250] sm:$0xff] %v391_v24  ;;  %v397_v36 = vmul.f32 %v999_v0, %v108_v33  ;;  %v110_v38 = vld [vmem:[#allocation3 + $0x290] sm:$0xff]  ;;  %v111_v39 = vld [vmem:[#allocation3 + $0x298] sm:$0xff]  ;;  %680 = vst [vmem:[#allocation6 + $0x258] sm:$0xff] %v392_v28  ;;  %v398_v40 = vmul.f32 %v999_v0, %v109_v37 }
  0x3c   :  { %681 = vst [vmem:[#allocation6 + $0x260] sm:$0xff] %v393_v29  ;;  %682 = vst [vmem:[#allocation6 + $0x268] sm:$0xff] %v394_v30  ;;  %v399_v41 = vmul.f32 %v999_v0, %v110_v38  ;;  %v400_v42 = vmul.f32 %v999_v0, %v111_v39  ;;  %v112_v43 = vld [vmem:[#allocation3 + $0x2a0] sm:$0xff]  ;;  %v113_v44 = vld [vmem:[#allocation3 + $0x2a8] sm:$0xff] }
  0x3d   :  { %v114_v45 = vld [vmem:[#allocation3 + $0x2b0] sm:$0xff]  ;;  %683 = vst [vmem:[#allocation6 + $0x270] sm:$0xff] %v395_v34  ;;  %684 = vst [vmem:[#allocation6 + $0x278] sm:$0xff] %v396_v35  ;;  %v401_v46 = vmul.f32 %v999_v0, %v112_v43  ;;  %v402_v47 = vmul.f32 %v999_v0, %v113_v44  ;;  %v115_v49 = vld [vmem:[#allocation3 + $0x2b8] sm:$0xff] }
  0x3e   :  { %685 = vst [vmem:[#allocation6 + $0x280] sm:$0xff] %v397_v36  ;;  %v403_v48 = vmul.f32 %v999_v0, %v114_v45  ;;  %v116_v50 = vld [vmem:[#allocation3 + $0x2c0] sm:$0xff]  ;;  %v117_v51 = vld [vmem:[#allocation3 + $0x2c8] sm:$0xff]  ;;  %686 = vst [vmem:[#allocation6 + $0x288] sm:$0xff] %v398_v40  ;;  %v404_v52 = vmul.f32 %v999_v0, %v115_v49 }
  0x3f   :  { %687 = vst [vmem:[#allocation6 + $0x290] sm:$0xff] %v399_v41  ;;  %688 = vst [vmem:[#allocation6 + $0x298] sm:$0xff] %v400_v42  ;;  %v405_v53 = vmul.f32 %v999_v0, %v116_v50  ;;  %v406_v54 = vmul.f32 %v999_v0, %v117_v51  ;;  %v118_v55 = vld [vmem:[#allocation3 + $0x2d0] sm:$0xff]  ;;  %v119_v56 = vld [vmem:[#allocation3 + $0x2d8] sm:$0xff] }
  0x40   :  { %v120_v57 = vld [vmem:[#allocation3 + $0x2e0] sm:$0xff]  ;;  %689 = vst [vmem:[#allocation6 + $0x2a0] sm:$0xff] %v401_v46  ;;  %690 = vst [vmem:[#allocation6 + $0x2a8] sm:$0xff] %v402_v47  ;;  %v407_v58 = vmul.f32 %v999_v0, %v118_v55  ;;  %v408_v59 = vmul.f32 %v999_v0, %v119_v56  ;;  %v121_v61 = vld [vmem:[#allocation3 + $0x2e8] sm:$0xff] }
  0x41   :  { %691 = vst [vmem:[#allocation6 + $0x2b0] sm:$0xff] %v403_v48  ;;  %v409_v60 = vmul.f32 %v999_v0, %v120_v57  ;;  %v122_v62 = vld [vmem:[#allocation3 + $0x2f0] sm:$0xff]  ;;  %v123_v63 = vld [vmem:[#allocation3 + $0x2f8] sm:$0xff]  ;;  %692 = vst [vmem:[#allocation6 + $0x2b8] sm:$0xff] %v404_v52  ;;  %v410_v1 = vmul.f32 %v999_v0, %v121_v61 }
  0x42   :  { %693 = vst [vmem:[#allocation6 + $0x2c0] sm:$0xff] %v405_v53  ;;  %694 = vst [vmem:[#allocation6 + $0x2c8] sm:$0xff] %v406_v54  ;;  %v411_v2 = vmul.f32 %v999_v0, %v122_v62  ;;  %v412_v3 = vmul.f32 %v999_v0, %v123_v63  ;;  %v124_v4 = vld [vmem:[#allocation3 + $0x300] sm:$0xff]  ;;  %v125_v5 = vld [vmem:[#allocation3 + $0x308] sm:$0xff] }
  0x43   :  { %v126_v6 = vld [vmem:[#allocation3 + $0x310] sm:$0xff]  ;;  %695 = vst [vmem:[#allocation6 + $0x2d0] sm:$0xff] %v407_v58  ;;  %696 = vst [vmem:[#allocation6 + $0x2d8] sm:$0xff] %v408_v59  ;;  %v413_v7 = vmul.f32 %v999_v0, %v124_v4  ;;  %v414_v8 = vmul.f32 %v999_v0, %v125_v5  ;;  %v127_v10 = vld [vmem:[#allocation3 + $0x318] sm:$0xff] }
  0x44   :  { %697 = vst [vmem:[#allocation6 + $0x2e0] sm:$0xff] %v409_v60  ;;  %v415_v9 = vmul.f32 %v999_v0, %v126_v6  ;;  %v128_v11 = vld [vmem:[#allocation3 + $0x320] sm:$0xff]  ;;  %v129_v12 = vld [vmem:[#allocation3 + $0x328] sm:$0xff]  ;;  %698 = vst [vmem:[#allocation6 + $0x2e8] sm:$0xff] %v410_v1  ;;  %v416_v13 = vmul.f32 %v999_v0, %v127_v10 }
  0x45   :  { %699 = vst [vmem:[#allocation6 + $0x2f0] sm:$0xff] %v411_v2  ;;  %700 = vst [vmem:[#allocation6 + $0x2f8] sm:$0xff] %v412_v3  ;;  %v417_v14 = vmul.f32 %v999_v0, %v128_v11  ;;  %v418_v15 = vmul.f32 %v999_v0, %v129_v12  ;;  %v130_v16 = vld [vmem:[#allocation3 + $0x330] sm:$0xff]  ;;  %v131_v17 = vld [vmem:[#allocation3 + $0x338] sm:$0xff] }
  0x46   :  { %v132_v18 = vld [vmem:[#allocation3 + $0x340] sm:$0xff]  ;;  %701 = vst [vmem:[#allocation6 + $0x300] sm:$0xff] %v413_v7  ;;  %702 = vst [vmem:[#allocation6 + $0x308] sm:$0xff] %v414_v8  ;;  %v419_v19 = vmul.f32 %v999_v0, %v130_v16  ;;  %v420_v20 = vmul.f32 %v999_v0, %v131_v17  ;;  %v133_v22 = vld [vmem:[#allocation3 + $0x348] sm:$0xff] }
  0x47   :  { %703 = vst [vmem:[#allocation6 + $0x310] sm:$0xff] %v415_v9  ;;  %v421_v21 = vmul.f32 %v999_v0, %v132_v18  ;;  %v134_v23 = vld [vmem:[#allocation3 + $0x350] sm:$0xff]  ;;  %v135_v24 = vld [vmem:[#allocation3 + $0x358] sm:$0xff]  ;;  %704 = vst [vmem:[#allocation6 + $0x318] sm:$0xff] %v416_v13  ;;  %v422_v25 = vmul.f32 %v999_v0, %v133_v22 }
  0x48   :  { %705 = vst [vmem:[#allocation6 + $0x320] sm:$0xff] %v417_v14  ;;  %706 = vst [vmem:[#allocation6 + $0x328] sm:$0xff] %v418_v15  ;;  %v423_v26 = vmul.f32 %v999_v0, %v134_v23  ;;  %v424_v27 = vmul.f32 %v999_v0, %v135_v24  ;;  %v136_v28 = vld [vmem:[#allocation3 + $0x360] sm:$0xff]  ;;  %v137_v29 = vld [vmem:[#allocation3 + $0x368] sm:$0xff] }
  0x49   :  { %v138_v30 = vld [vmem:[#allocation3 + $0x370] sm:$0xff]  ;;  %707 = vst [vmem:[#allocation6 + $0x330] sm:$0xff] %v419_v19  ;;  %708 = vst [vmem:[#allocation6 + $0x338] sm:$0xff] %v420_v20  ;;  %v425_v31 = vmul.f32 %v999_v0, %v136_v28  ;;  %v426_v32 = vmul.f32 %v999_v0, %v137_v29  ;;  %v139_v34 = vld [vmem:[#allocation3 + $0x378] sm:$0xff] }
  0x4a   :  { %709 = vst [vmem:[#allocation6 + $0x340] sm:$0xff] %v421_v21  ;;  %v427_v33 = vmul.f32 %v999_v0, %v138_v30  ;;  %v140_v35 = vld [vmem:[#allocation3 + $0x380] sm:$0xff]  ;;  %v141_v36 = vld [vmem:[#allocation3 + $0x388] sm:$0xff]  ;;  %710 = vst [vmem:[#allocation6 + $0x348] sm:$0xff] %v422_v25  ;;  %v428_v37 = vmul.f32 %v999_v0, %v139_v34 }
  0x4b   :  { %711 = vst [vmem:[#allocation6 + $0x350] sm:$0xff] %v423_v26  ;;  %712 = vst [vmem:[#allocation6 + $0x358] sm:$0xff] %v424_v27  ;;  %v429_v38 = vmul.f32 %v999_v0, %v140_v35  ;;  %v430_v39 = vmul.f32 %v999_v0, %v141_v36  ;;  %v142_v40 = vld [vmem:[#allocation3 + $0x390] sm:$0xff]  ;;  %v143_v41 = vld [vmem:[#allocation3 + $0x398] sm:$0xff] }
  0x4c   :  { %v144_v42 = vld [vmem:[#allocation3 + $0x3a0] sm:$0xff]  ;;  %713 = vst [vmem:[#allocation6 + $0x360] sm:$0xff] %v425_v31  ;;  %714 = vst [vmem:[#allocation6 + $0x368] sm:$0xff] %v426_v32  ;;  %v431_v43 = vmul.f32 %v999_v0, %v142_v40  ;;  %v432_v44 = vmul.f32 %v999_v0, %v143_v41  ;;  %v145_v46 = vld [vmem:[#allocation3 + $0x3a8] sm:$0xff] }
  0x4d   :  { %715 = vst [vmem:[#allocation6 + $0x370] sm:$0xff] %v427_v33  ;;  %v433_v45 = vmul.f32 %v999_v0, %v144_v42  ;;  %v146_v47 = vld [vmem:[#allocation3 + $0x3b0] sm:$0xff]  ;;  %v147_v48 = vld [vmem:[#allocation3 + $0x3b8] sm:$0xff]  ;;  %716 = vst [vmem:[#allocation6 + $0x378] sm:$0xff] %v428_v37  ;;  %v434_v49 = vmul.f32 %v999_v0, %v145_v46 }
  0x4e   :  { %717 = vst [vmem:[#allocation6 + $0x380] sm:$0xff] %v429_v38  ;;  %718 = vst [vmem:[#allocation6 + $0x388] sm:$0xff] %v430_v39  ;;  %v435_v50 = vmul.f32 %v999_v0, %v146_v47  ;;  %v436_v51 = vmul.f32 %v999_v0, %v147_v48  ;;  %v148_v52 = vld [vmem:[#allocation3 + $0x3c0] sm:$0xff]  ;;  %v149_v53 = vld [vmem:[#allocation3 + $0x3c8] sm:$0xff] }
  0x4f   :  { %v150_v54 = vld [vmem:[#allocation3 + $0x3d0] sm:$0xff]  ;;  %719 = vst [vmem:[#allocation6 + $0x390] sm:$0xff] %v431_v43  ;;  %720 = vst [vmem:[#allocation6 + $0x398] sm:$0xff] %v432_v44  ;;  %v437_v55 = vmul.f32 %v999_v0, %v148_v52  ;;  %v438_v56 = vmul.f32 %v999_v0, %v149_v53  ;;  %v151_v58 = vld [vmem:[#allocation3 + $0x3d8] sm:$0xff] }
  0x50   :  { %721 = vst [vmem:[#allocation6 + $0x3a0] sm:$0xff] %v433_v45  ;;  %v439_v57 = vmul.f32 %v999_v0, %v150_v54  ;;  %v152_v59 = vld [vmem:[#allocation3 + $0x3e0] sm:$0xff]  ;;  %v153_v60 = vld [vmem:[#allocation3 + $0x3e8] sm:$0xff]  ;;  %722 = vst [vmem:[#allocation6 + $0x3a8] sm:$0xff] %v434_v49  ;;  %v440_v61 = vmul.f32 %v999_v0, %v151_v58 }
  0x51   :  { %723 = vst [vmem:[#allocation6 + $0x3b0] sm:$0xff] %v435_v50  ;;  %724 = vst [vmem:[#allocation6 + $0x3b8] sm:$0xff] %v436_v51  ;;  %v441_v62 = vmul.f32 %v999_v0, %v152_v59  ;;  %v442_v63 = vmul.f32 %v999_v0, %v153_v60  ;;  %v154_v1 = vld [vmem:[#allocation3 + $0x3f0] sm:$0xff]  ;;  %v155_v2 = vld [vmem:[#allocation3 + $0x3f8] sm:$0xff] }
  0x52   :  { %v156_v3 = vld [vmem:[#allocation3 + $0x400] sm:$0xff]  ;;  %725 = vst [vmem:[#allocation6 + $0x3c0] sm:$0xff] %v437_v55  ;;  %726 = vst [vmem:[#allocation6 + $0x3c8] sm:$0xff] %v438_v56  ;;  %v443_v4 = vmul.f32 %v999_v0, %v154_v1  ;;  %v444_v5 = vmul.f32 %v999_v0, %v155_v2  ;;  %v157_v7 = vld [vmem:[#allocation3 + $0x408] sm:$0xff] }
  0x53   :  { %727 = vst [vmem:[#allocation6 + $0x3d0] sm:$0xff] %v439_v57  ;;  %v445_v6 = vmul.f32 %v999_v0, %v156_v3  ;;  %v158_v8 = vld [vmem:[#allocation3 + $0x410] sm:$0xff]  ;;  %v159_v9 = vld [vmem:[#allocation3 + $0x418] sm:$0xff]  ;;  %728 = vst [vmem:[#allocation6 + $0x3d8] sm:$0xff] %v440_v61  ;;  %v446_v10 = vmul.f32 %v999_v0, %v157_v7 }
  0x54   :  { %729 = vst [vmem:[#allocation6 + $0x3e0] sm:$0xff] %v441_v62  ;;  %730 = vst [vmem:[#allocation6 + $0x3e8] sm:$0xff] %v442_v63  ;;  %v447_v11 = vmul.f32 %v999_v0, %v158_v8  ;;  %v448_v12 = vmul.f32 %v999_v0, %v159_v9  ;;  %v160_v13 = vld [vmem:[#allocation3 + $0x420] sm:$0xff]  ;;  %v161_v14 = vld [vmem:[#allocation3 + $0x428] sm:$0xff] }
  0x55   :  { %v162_v15 = vld [vmem:[#allocation3 + $0x430] sm:$0xff]  ;;  %731 = vst [vmem:[#allocation6 + $0x3f0] sm:$0xff] %v443_v4  ;;  %732 = vst [vmem:[#allocation6 + $0x3f8] sm:$0xff] %v444_v5  ;;  %v449_v16 = vmul.f32 %v999_v0, %v160_v13  ;;  %v450_v17 = vmul.f32 %v999_v0, %v161_v14  ;;  %v163_v19 = vld [vmem:[#allocation3 + $0x438] sm:$0xff] }
  0x56   :  { %733 = vst [vmem:[#allocation6 + $0x400] sm:$0xff] %v445_v6  ;;  %v451_v18 = vmul.f32 %v999_v0, %v162_v15  ;;  %v164_v20 = vld [vmem:[#allocation3 + $0x440] sm:$0xff]  ;;  %v165_v21 = vld [vmem:[#allocation3 + $0x448] sm:$0xff]  ;;  %734 = vst [vmem:[#allocation6 + $0x408] sm:$0xff] %v446_v10  ;;  %v452_v22 = vmul.f32 %v999_v0, %v163_v19 }
  0x57   :  { %735 = vst [vmem:[#allocation6 + $0x410] sm:$0xff] %v447_v11  ;;  %736 = vst [vmem:[#allocation6 + $0x418] sm:$0xff] %v448_v12  ;;  %v453_v23 = vmul.f32 %v999_v0, %v164_v20  ;;  %v454_v24 = vmul.f32 %v999_v0, %v165_v21  ;;  %v166_v25 = vld [vmem:[#allocation3 + $0x450] sm:$0xff]  ;;  %v167_v26 = vld [vmem:[#allocation3 + $0x458] sm:$0xff] }
  0x58   :  { %v168_v27 = vld [vmem:[#allocation3 + $0x460] sm:$0xff]  ;;  %737 = vst [vmem:[#allocation6 + $0x420] sm:$0xff] %v449_v16  ;;  %738 = vst [vmem:[#allocation6 + $0x428] sm:$0xff] %v450_v17  ;;  %v455_v28 = vmul.f32 %v999_v0, %v166_v25  ;;  %v456_v29 = vmul.f32 %v999_v0, %v167_v26  ;;  %v169_v31 = vld [vmem:[#allocation3 + $0x468] sm:$0xff] }
  0x59   :  { %739 = vst [vmem:[#allocation6 + $0x430] sm:$0xff] %v451_v18  ;;  %v457_v30 = vmul.f32 %v999_v0, %v168_v27  ;;  %v170_v32 = vld [vmem:[#allocation3 + $0x470] sm:$0xff]  ;;  %v171_v33 = vld [vmem:[#allocation3 + $0x478] sm:$0xff]  ;;  %740 = vst [vmem:[#allocation6 + $0x438] sm:$0xff] %v452_v22  ;;  %v458_v34 = vmul.f32 %v999_v0, %v169_v31 }
  0x5a   :  { %741 = vst [vmem:[#allocation6 + $0x440] sm:$0xff] %v453_v23  ;;  %742 = vst [vmem:[#allocation6 + $0x448] sm:$0xff] %v454_v24  ;;  %v459_v35 = vmul.f32 %v999_v0, %v170_v32  ;;  %v460_v36 = vmul.f32 %v999_v0, %v171_v33  ;;  %v172_v37 = vld [vmem:[#allocation3 + $0x480] sm:$0xff]  ;;  %v173_v38 = vld [vmem:[#allocation3 + $0x488] sm:$0xff] }
  0x5b   :  { %v174_v39 = vld [vmem:[#allocation3 + $0x490] sm:$0xff]  ;;  %743 = vst [vmem:[#allocation6 + $0x450] sm:$0xff] %v455_v28  ;;  %744 = vst [vmem:[#allocation6 + $0x458] sm:$0xff] %v456_v29  ;;  %v461_v40 = vmul.f32 %v999_v0, %v172_v37  ;;  %v462_v41 = vmul.f32 %v999_v0, %v173_v38  ;;  %v175_v43 = vld [vmem:[#allocation3 + $0x498] sm:$0xff] }
  0x5c   :  { %745 = vst [vmem:[#allocation6 + $0x460] sm:$0xff] %v457_v30  ;;  %v463_v42 = vmul.f32 %v999_v0, %v174_v39  ;;  %v176_v44 = vld [vmem:[#allocation3 + $0x4a0] sm:$0xff]  ;;  %v177_v45 = vld [vmem:[#allocation3 + $0x4a8] sm:$0xff]  ;;  %746 = vst [vmem:[#allocation6 + $0x468] sm:$0xff] %v458_v34  ;;  %v464_v46 = vmul.f32 %v999_v0, %v175_v43 }
  0x5d   :  { %747 = vst [vmem:[#allocation6 + $0x470] sm:$0xff] %v459_v35  ;;  %748 = vst [vmem:[#allocation6 + $0x478] sm:$0xff] %v460_v36  ;;  %v465_v47 = vmul.f32 %v999_v0, %v176_v44  ;;  %v466_v48 = vmul.f32 %v999_v0, %v177_v45  ;;  %v178_v49 = vld [vmem:[#allocation3 + $0x4b0] sm:$0xff]  ;;  %v179_v50 = vld [vmem:[#allocation3 + $0x4b8] sm:$0xff] }
  0x5e   :  { %v180_v51 = vld [vmem:[#allocation3 + $0x4c0] sm:$0xff]  ;;  %749 = vst [vmem:[#allocation6 + $0x480] sm:$0xff] %v461_v40  ;;  %750 = vst [vmem:[#allocation6 + $0x488] sm:$0xff] %v462_v41  ;;  %v467_v52 = vmul.f32 %v999_v0, %v178_v49  ;;  %v468_v53 = vmul.f32 %v999_v0, %v179_v50  ;;  %v181_v55 = vld [vmem:[#allocation3 + $0x4c8] sm:$0xff] }
  0x5f   :  { %751 = vst [vmem:[#allocation6 + $0x490] sm:$0xff] %v463_v42  ;;  %v469_v54 = vmul.f32 %v999_v0, %v180_v51  ;;  %v182_v56 = vld [vmem:[#allocation3 + $0x4d0] sm:$0xff]  ;;  %v183_v57 = vld [vmem:[#allocation3 + $0x4d8] sm:$0xff]  ;;  %752 = vst [vmem:[#allocation6 + $0x498] sm:$0xff] %v464_v46  ;;  %v470_v58 = vmul.f32 %v999_v0, %v181_v55 }
  0x60   :  { %753 = vst [vmem:[#allocation6 + $0x4a0] sm:$0xff] %v465_v47  ;;  %754 = vst [vmem:[#allocation6 + $0x4a8] sm:$0xff] %v466_v48  ;;  %v471_v59 = vmul.f32 %v999_v0, %v182_v56  ;;  %v472_v60 = vmul.f32 %v999_v0, %v183_v57  ;;  %v184_v61 = vld [vmem:[#allocation3 + $0x4e0] sm:$0xff]  ;;  %v185_v62 = vld [vmem:[#allocation3 + $0x4e8] sm:$0xff] }
  0x61   :  { %v186_v63 = vld [vmem:[#allocation3 + $0x4f0] sm:$0xff]  ;;  %755 = vst [vmem:[#allocation6 + $0x4b0] sm:$0xff] %v467_v52  ;;  %756 = vst [vmem:[#allocation6 + $0x4b8] sm:$0xff] %v468_v53  ;;  %v473_v1 = vmul.f32 %v999_v0, %v184_v61  ;;  %v474_v2 = vmul.f32 %v999_v0, %v185_v62  ;;  %v187_v4 = vld [vmem:[#allocation3 + $0x4f8] sm:$0xff] }
  0x62   :  { %757 = vst [vmem:[#allocation6 + $0x4c0] sm:$0xff] %v469_v54  ;;  %v475_v3 = vmul.f32 %v999_v0, %v186_v63  ;;  %v188_v5 = vld [vmem:[#allocation3 + $0x500] sm:$0xff]  ;;  %v189_v6 = vld [vmem:[#allocation3 + $0x508] sm:$0xff]  ;;  %758 = vst [vmem:[#allocation6 + $0x4c8] sm:$0xff] %v470_v58  ;;  %v476_v7 = vmul.f32 %v999_v0, %v187_v4 }
  0x63   :  { %759 = vst [vmem:[#allocation6 + $0x4d0] sm:$0xff] %v471_v59  ;;  %760 = vst [vmem:[#allocation6 + $0x4d8] sm:$0xff] %v472_v60  ;;  %v477_v8 = vmul.f32 %v999_v0, %v188_v5  ;;  %v478_v9 = vmul.f32 %v999_v0, %v189_v6  ;;  %v190_v10 = vld [vmem:[#allocation3 + $0x510] sm:$0xff]  ;;  %v191_v11 = vld [vmem:[#allocation3 + $0x518] sm:$0xff] }
  0x64   :  { %v192_v12 = vld [vmem:[#allocation3 + $0x520] sm:$0xff]  ;;  %761 = vst [vmem:[#allocation6 + $0x4e0] sm:$0xff] %v473_v1  ;;  %762 = vst [vmem:[#allocation6 + $0x4e8] sm:$0xff] %v474_v2  ;;  %v479_v13 = vmul.f32 %v999_v0, %v190_v10  ;;  %v480_v14 = vmul.f32 %v999_v0, %v191_v11  ;;  %v193_v16 = vld [vmem:[#allocation3 + $0x528] sm:$0xff] }
  0x65   :  { %763 = vst [vmem:[#allocation6 + $0x4f0] sm:$0xff] %v475_v3  ;;  %v481_v15 = vmul.f32 %v999_v0, %v192_v12  ;;  %v194_v17 = vld [vmem:[#allocation3 + $0x530] sm:$0xff]  ;;  %v195_v18 = vld [vmem:[#allocation3 + $0x538] sm:$0xff]  ;;  %764 = vst [vmem:[#allocation6 + $0x4f8] sm:$0xff] %v476_v7  ;;  %v482_v19 = vmul.f32 %v999_v0, %v193_v16 }
  0x66   :  { %765 = vst [vmem:[#allocation6 + $0x500] sm:$0xff] %v477_v8  ;;  %766 = vst [vmem:[#allocation6 + $0x508] sm:$0xff] %v478_v9  ;;  %v483_v20 = vmul.f32 %v999_v0, %v194_v17  ;;  %v484_v21 = vmul.f32 %v999_v0, %v195_v18  ;;  %v196_v22 = vld [vmem:[#allocation3 + $0x540] sm:$0xff]  ;;  %v197_v23 = vld [vmem:[#allocation3 + $0x548] sm:$0xff] }
  0x67   :  { %v198_v24 = vld [vmem:[#allocation3 + $0x550] sm:$0xff]  ;;  %767 = vst [vmem:[#allocation6 + $0x510] sm:$0xff] %v479_v13  ;;  %768 = vst [vmem:[#allocation6 + $0x518] sm:$0xff] %v480_v14  ;;  %v485_v25 = vmul.f32 %v999_v0, %v196_v22  ;;  %v486_v26 = vmul.f32 %v999_v0, %v197_v23  ;;  %v199_v28 = vld [vmem:[#allocation3 + $0x558] sm:$0xff] }
  0x68   :  { %769 = vst [vmem:[#allocation6 + $0x520] sm:$0xff] %v481_v15  ;;  %v487_v27 = vmul.f32 %v999_v0, %v198_v24  ;;  %v200_v29 = vld [vmem:[#allocation3 + $0x560] sm:$0xff]  ;;  %v201_v30 = vld [vmem:[#allocation3 + $0x568] sm:$0xff]  ;;  %770 = vst [vmem:[#allocation6 + $0x528] sm:$0xff] %v482_v19  ;;  %v488_v31 = vmul.f32 %v999_v0, %v199_v28 }
  0x69   :  { %771 = vst [vmem:[#allocation6 + $0x530] sm:$0xff] %v483_v20  ;;  %772 = vst [vmem:[#allocation6 + $0x538] sm:$0xff] %v484_v21  ;;  %v489_v32 = vmul.f32 %v999_v0, %v200_v29  ;;  %v490_v33 = vmul.f32 %v999_v0, %v201_v30  ;;  %v202_v34 = vld [vmem:[#allocation3 + $0x570] sm:$0xff]  ;;  %v203_v35 = vld [vmem:[#allocation3 + $0x578] sm:$0xff] }
  0x6a   :  { %v204_v36 = vld [vmem:[#allocation3 + $0x580] sm:$0xff]  ;;  %773 = vst [vmem:[#allocation6 + $0x540] sm:$0xff] %v485_v25  ;;  %774 = vst [vmem:[#allocation6 + $0x548] sm:$0xff] %v486_v26  ;;  %v491_v37 = vmul.f32 %v999_v0, %v202_v34  ;;  %v492_v38 = vmul.f32 %v999_v0, %v203_v35  ;;  %v205_v40 = vld [vmem:[#allocation3 + $0x588] sm:$0xff] }
  0x6b   :  { %775 = vst [vmem:[#allocation6 + $0x550] sm:$0xff] %v487_v27  ;;  %v493_v39 = vmul.f32 %v999_v0, %v204_v36  ;;  %v206_v41 = vld [vmem:[#allocation3 + $0x590] sm:$0xff]  ;;  %v207_v42 = vld [vmem:[#allocation3 + $0x598] sm:$0xff]  ;;  %776 = vst [vmem:[#allocation6 + $0x558] sm:$0xff] %v488_v31  ;;  %v494_v43 = vmul.f32 %v999_v0, %v205_v40 }
  0x6c   :  { %777 = vst [vmem:[#allocation6 + $0x560] sm:$0xff] %v489_v32  ;;  %778 = vst [vmem:[#allocation6 + $0x568] sm:$0xff] %v490_v33  ;;  %v495_v44 = vmul.f32 %v999_v0, %v206_v41  ;;  %v496_v45 = vmul.f32 %v999_v0, %v207_v42  ;;  %v208_v46 = vld [vmem:[#allocation3 + $0x5a0] sm:$0xff]  ;;  %v209_v47 = vld [vmem:[#allocation3 + $0x5a8] sm:$0xff] }
  0x6d   :  { %v210_v48 = vld [vmem:[#allocation3 + $0x5b0] sm:$0xff]  ;;  %779 = vst [vmem:[#allocation6 + $0x570] sm:$0xff] %v491_v37  ;;  %780 = vst [vmem:[#allocation6 + $0x578] sm:$0xff] %v492_v38  ;;  %v497_v49 = vmul.f32 %v999_v0, %v208_v46  ;;  %v498_v50 = vmul.f32 %v999_v0, %v209_v47  ;;  %v211_v52 = vld [vmem:[#allocation3 + $0x5b8] sm:$0xff] }
  0x6e   :  { %781 = vst [vmem:[#allocation6 + $0x580] sm:$0xff] %v493_v39  ;;  %v499_v51 = vmul.f32 %v999_v0, %v210_v48  ;;  %v212_v53 = vld [vmem:[#allocation3 + $0x5c0] sm:$0xff]  ;;  %v213_v54 = vld [vmem:[#allocation3 + $0x5c8] sm:$0xff]  ;;  %782 = vst [vmem:[#allocation6 + $0x588] sm:$0xff] %v494_v43  ;;  %v500_v55 = vmul.f32 %v999_v0, %v211_v52 }
  0x6f   :  { %783 = vst [vmem:[#allocation6 + $0x590] sm:$0xff] %v495_v44  ;;  %784 = vst [vmem:[#allocation6 + $0x598] sm:$0xff] %v496_v45  ;;  %v501_v56 = vmul.f32 %v999_v0, %v212_v53  ;;  %v502_v57 = vmul.f32 %v999_v0, %v213_v54  ;;  %v214_v58 = vld [vmem:[#allocation3 + $0x5d0] sm:$0xff]  ;;  %v215_v59 = vld [vmem:[#allocation3 + $0x5d8] sm:$0xff] }
  0x70   :  { %v216_v60 = vld [vmem:[#allocation3 + $0x5e0] sm:$0xff]  ;;  %785 = vst [vmem:[#allocation6 + $0x5a0] sm:$0xff] %v497_v49  ;;  %786 = vst [vmem:[#allocation6 + $0x5a8] sm:$0xff] %v498_v50  ;;  %v503_v61 = vmul.f32 %v999_v0, %v214_v58  ;;  %v504_v62 = vmul.f32 %v999_v0, %v215_v59  ;;  %v217_v1 = vld [vmem:[#allocation3 + $0x5e8] sm:$0xff] }
  0x71   :  { %787 = vst [vmem:[#allocation6 + $0x5b0] sm:$0xff] %v499_v51  ;;  %v505_v63 = vmul.f32 %v999_v0, %v216_v60  ;;  %v218_v2 = vld [vmem:[#allocation3 + $0x5f0] sm:$0xff]  ;;  %v219_v3 = vld [vmem:[#allocation3 + $0x5f8] sm:$0xff]  ;;  %788 = vst [vmem:[#allocation6 + $0x5b8] sm:$0xff] %v500_v55  ;;  %v506_v4 = vmul.f32 %v999_v0, %v217_v1 }
  0x72   :  { %789 = vst [vmem:[#allocation6 + $0x5c0] sm:$0xff] %v501_v56  ;;  %790 = vst [vmem:[#allocation6 + $0x5c8] sm:$0xff] %v502_v57  ;;  %v507_v5 = vmul.f32 %v999_v0, %v218_v2  ;;  %v508_v6 = vmul.f32 %v999_v0, %v219_v3  ;;  %v220_v7 = vld [vmem:[#allocation3 + $0x600] sm:$0xff]  ;;  %v221_v8 = vld [vmem:[#allocation3 + $0x608] sm:$0xff] }
  0x73   :  { %v222_v9 = vld [vmem:[#allocation3 + $0x610] sm:$0xff]  ;;  %791 = vst [vmem:[#allocation6 + $0x5d0] sm:$0xff] %v503_v61  ;;  %792 = vst [vmem:[#allocation6 + $0x5d8] sm:$0xff] %v504_v62  ;;  %v509_v10 = vmul.f32 %v999_v0, %v220_v7  ;;  %v510_v11 = vmul.f32 %v999_v0, %v221_v8  ;;  %v223_v13 = vld [vmem:[#allocation3 + $0x618] sm:$0xff] }
  0x74   :  { %793 = vst [vmem:[#allocation6 + $0x5e0] sm:$0xff] %v505_v63  ;;  %v511_v12 = vmul.f32 %v999_v0, %v222_v9  ;;  %v224_v14 = vld [vmem:[#allocation3 + $0x620] sm:$0xff]  ;;  %v225_v15 = vld [vmem:[#allocation3 + $0x628] sm:$0xff]  ;;  %794 = vst [vmem:[#allocation6 + $0x5e8] sm:$0xff] %v506_v4  ;;  %v512_v16 = vmul.f32 %v999_v0, %v223_v13 }
  0x75   :  { %795 = vst [vmem:[#allocation6 + $0x5f0] sm:$0xff] %v507_v5  ;;  %796 = vst [vmem:[#allocation6 + $0x5f8] sm:$0xff] %v508_v6  ;;  %v513_v17 = vmul.f32 %v999_v0, %v224_v14  ;;  %v514_v18 = vmul.f32 %v999_v0, %v225_v15  ;;  %v226_v19 = vld [vmem:[#allocation3 + $0x630] sm:$0xff]  ;;  %v227_v20 = vld [vmem:[#allocation3 + $0x638] sm:$0xff] }
  0x76   :  { %v228_v21 = vld [vmem:[#allocation3 + $0x640] sm:$0xff]  ;;  %797 = vst [vmem:[#allocation6 + $0x600] sm:$0xff] %v509_v10  ;;  %798 = vst [vmem:[#allocation6 + $0x608] sm:$0xff] %v510_v11  ;;  %v515_v22 = vmul.f32 %v999_v0, %v226_v19  ;;  %v516_v23 = vmul.f32 %v999_v0, %v227_v20  ;;  %v229_v25 = vld [vmem:[#allocation3 + $0x648] sm:$0xff] }
  0x77   :  { %799 = vst [vmem:[#allocation6 + $0x610] sm:$0xff] %v511_v12  ;;  %v517_v24 = vmul.f32 %v999_v0, %v228_v21  ;;  %v230_v26 = vld [vmem:[#allocation3 + $0x650] sm:$0xff]  ;;  %v231_v27 = vld [vmem:[#allocation3 + $0x658] sm:$0xff]  ;;  %800 = vst [vmem:[#allocation6 + $0x618] sm:$0xff] %v512_v16  ;;  %v518_v28 = vmul.f32 %v999_v0, %v229_v25 }
  0x78   :  { %801 = vst [vmem:[#allocation6 + $0x620] sm:$0xff] %v513_v17  ;;  %802 = vst [vmem:[#allocation6 + $0x628] sm:$0xff] %v514_v18  ;;  %v519_v29 = vmul.f32 %v999_v0, %v230_v26  ;;  %v520_v30 = vmul.f32 %v999_v0, %v231_v27  ;;  %v232_v31 = vld [vmem:[#allocation3 + $0x660] sm:$0xff]  ;;  %v233_v32 = vld [vmem:[#allocation3 + $0x668] sm:$0xff] }
  0x79   :  { %v234_v33 = vld [vmem:[#allocation3 + $0x670] sm:$0xff]  ;;  %803 = vst [vmem:[#allocation6 + $0x630] sm:$0xff] %v515_v22  ;;  %804 = vst [vmem:[#allocation6 + $0x638] sm:$0xff] %v516_v23  ;;  %v521_v34 = vmul.f32 %v999_v0, %v232_v31  ;;  %v522_v35 = vmul.f32 %v999_v0, %v233_v32  ;;  %v235_v37 = vld [vmem:[#allocation3 + $0x678] sm:$0xff] }
  0x7a   :  { %805 = vst [vmem:[#allocation6 + $0x640] sm:$0xff] %v517_v24  ;;  %v523_v36 = vmul.f32 %v999_v0, %v234_v33  ;;  %v236_v38 = vld [vmem:[#allocation3 + $0x680] sm:$0xff]  ;;  %v237_v39 = vld [vmem:[#allocation3 + $0x688] sm:$0xff]  ;;  %806 = vst [vmem:[#allocation6 + $0x648] sm:$0xff] %v518_v28  ;;  %v524_v40 = vmul.f32 %v999_v0, %v235_v37 }
  0x7b   :  { %807 = vst [vmem:[#allocation6 + $0x650] sm:$0xff] %v519_v29  ;;  %808 = vst [vmem:[#allocation6 + $0x658] sm:$0xff] %v520_v30  ;;  %v525_v41 = vmul.f32 %v999_v0, %v236_v38  ;;  %v526_v42 = vmul.f32 %v999_v0, %v237_v39  ;;  %v238_v43 = vld [vmem:[#allocation3 + $0x690] sm:$0xff]  ;;  %v239_v44 = vld [vmem:[#allocation3 + $0x698] sm:$0xff] }
  0x7c   :  { %v240_v45 = vld [vmem:[#allocation3 + $0x6a0] sm:$0xff]  ;;  %809 = vst [vmem:[#allocation6 + $0x660] sm:$0xff] %v521_v34  ;;  %810 = vst [vmem:[#allocation6 + $0x668] sm:$0xff] %v522_v35  ;;  %v527_v46 = vmul.f32 %v999_v0, %v238_v43  ;;  %v528_v47 = vmul.f32 %v999_v0, %v239_v44  ;;  %v241_v49 = vld [vmem:[#allocation3 + $0x6a8] sm:$0xff] }
  0x7d   :  { %811 = vst [vmem:[#allocation6 + $0x670] sm:$0xff] %v523_v36  ;;  %v529_v48 = vmul.f32 %v999_v0, %v240_v45  ;;  %v242_v50 = vld [vmem:[#allocation3 + $0x6b0] sm:$0xff]  ;;  %v243_v51 = vld [vmem:[#allocation3 + $0x6b8] sm:$0xff]  ;;  %812 = vst [vmem:[#allocation6 + $0x678] sm:$0xff] %v524_v40  ;;  %v530_v52 = vmul.f32 %v999_v0, %v241_v49 }
  0x7e   :  { %813 = vst [vmem:[#allocation6 + $0x680] sm:$0xff] %v525_v41  ;;  %814 = vst [vmem:[#allocation6 + $0x688] sm:$0xff] %v526_v42  ;;  %v531_v53 = vmul.f32 %v999_v0, %v242_v50  ;;  %v532_v54 = vmul.f32 %v999_v0, %v243_v51  ;;  %v244_v55 = vld [vmem:[#allocation3 + $0x6c0] sm:$0xff]  ;;  %v245_v56 = vld [vmem:[#allocation3 + $0x6c8] sm:$0xff] }
  0x7f   :  { %v246_v57 = vld [vmem:[#allocation3 + $0x6d0] sm:$0xff]  ;;  %815 = vst [vmem:[#allocation6 + $0x690] sm:$0xff] %v527_v46  ;;  %816 = vst [vmem:[#allocation6 + $0x698] sm:$0xff] %v528_v47  ;;  %v533_v58 = vmul.f32 %v999_v0, %v244_v55  ;;  %v534_v59 = vmul.f32 %v999_v0, %v245_v56  ;;  %v247_v61 = vld [vmem:[#allocation3 + $0x6d8] sm:$0xff] }
  0x80   :  { %817 = vst [vmem:[#allocation6 + $0x6a0] sm:$0xff] %v529_v48  ;;  %v535_v60 = vmul.f32 %v999_v0, %v246_v57  ;;  %v248_v62 = vld [vmem:[#allocation3 + $0x6e0] sm:$0xff]  ;;  %v249_v63 = vld [vmem:[#allocation3 + $0x6e8] sm:$0xff]  ;;  %818 = vst [vmem:[#allocation6 + $0x6a8] sm:$0xff] %v530_v52  ;;  %v536_v1 = vmul.f32 %v999_v0, %v247_v61 }
  0x81   :  { %819 = vst [vmem:[#allocation6 + $0x6b0] sm:$0xff] %v531_v53  ;;  %820 = vst [vmem:[#allocation6 + $0x6b8] sm:$0xff] %v532_v54  ;;  %v537_v2 = vmul.f32 %v999_v0, %v248_v62  ;;  %v538_v3 = vmul.f32 %v999_v0, %v249_v63  ;;  %v250_v4 = vld [vmem:[#allocation3 + $0x6f0] sm:$0xff]  ;;  %v251_v5 = vld [vmem:[#allocation3 + $0x6f8] sm:$0xff] }
  0x82   :  { %v252_v6 = vld [vmem:[#allocation3 + $0x700] sm:$0xff]  ;;  %821 = vst [vmem:[#allocation6 + $0x6c0] sm:$0xff] %v533_v58  ;;  %822 = vst [vmem:[#allocation6 + $0x6c8] sm:$0xff] %v534_v59  ;;  %v539_v7 = vmul.f32 %v999_v0, %v250_v4  ;;  %v540_v8 = vmul.f32 %v999_v0, %v251_v5  ;;  %v253_v10 = vld [vmem:[#allocation3 + $0x708] sm:$0xff] }
  0x83   :  { %823 = vst [vmem:[#allocation6 + $0x6d0] sm:$0xff] %v535_v60  ;;  %v541_v9 = vmul.f32 %v999_v0, %v252_v6  ;;  %v254_v11 = vld [vmem:[#allocation3 + $0x710] sm:$0xff]  ;;  %v255_v12 = vld [vmem:[#allocation3 + $0x718] sm:$0xff]  ;;  %824 = vst [vmem:[#allocation6 + $0x6d8] sm:$0xff] %v536_v1  ;;  %v542_v13 = vmul.f32 %v999_v0, %v253_v10 }
  0x84   :  { %825 = vst [vmem:[#allocation6 + $0x6e0] sm:$0xff] %v537_v2  ;;  %826 = vst [vmem:[#allocation6 + $0x6e8] sm:$0xff] %v538_v3  ;;  %v543_v14 = vmul.f32 %v999_v0, %v254_v11  ;;  %v544_v15 = vmul.f32 %v999_v0, %v255_v12  ;;  %v256_v16 = vld [vmem:[#allocation3 + $0x720] sm:$0xff]  ;;  %v257_v17 = vld [vmem:[#allocation3 + $0x728] sm:$0xff] }
  0x85   :  { %v258_v18 = vld [vmem:[#allocation3 + $0x730] sm:$0xff]  ;;  %827 = vst [vmem:[#allocation6 + $0x6f0] sm:$0xff] %v539_v7  ;;  %828 = vst [vmem:[#allocation6 + $0x6f8] sm:$0xff] %v540_v8  ;;  %v545_v19 = vmul.f32 %v999_v0, %v256_v16  ;;  %v546_v20 = vmul.f32 %v999_v0, %v257_v17  ;;  %v259_v22 = vld [vmem:[#allocation3 + $0x738] sm:$0xff] }
  0x86   :  { %829 = vst [vmem:[#allocation6 + $0x700] sm:$0xff] %v541_v9  ;;  %v547_v21 = vmul.f32 %v999_v0, %v258_v18  ;;  %v260_v23 = vld [vmem:[#allocation3 + $0x740] sm:$0xff]  ;;  %v261_v24 = vld [vmem:[#allocation3 + $0x748] sm:$0xff]  ;;  %830 = vst [vmem:[#allocation6 + $0x708] sm:$0xff] %v542_v13  ;;  %v548_v25 = vmul.f32 %v999_v0, %v259_v22 }
  0x87   :  { %831 = vst [vmem:[#allocation6 + $0x710] sm:$0xff] %v543_v14  ;;  %832 = vst [vmem:[#allocation6 + $0x718] sm:$0xff] %v544_v15  ;;  %v549_v26 = vmul.f32 %v999_v0, %v260_v23  ;;  %v550_v27 = vmul.f32 %v999_v0, %v261_v24  ;;  %v262_v28 = vld [vmem:[#allocation3 + $0x750] sm:$0xff]  ;;  %v263_v29 = vld [vmem:[#allocation3 + $0x758] sm:$0xff] }
  0x88   :  { %v264_v30 = vld [vmem:[#allocation3 + $0x760] sm:$0xff]  ;;  %833 = vst [vmem:[#allocation6 + $0x720] sm:$0xff] %v545_v19  ;;  %834 = vst [vmem:[#allocation6 + $0x728] sm:$0xff] %v546_v20  ;;  %v551_v31 = vmul.f32 %v999_v0, %v262_v28  ;;  %v552_v32 = vmul.f32 %v999_v0, %v263_v29  ;;  %v265_v34 = vld [vmem:[#allocation3 + $0x768] sm:$0xff] }
  0x89   :  { %835 = vst [vmem:[#allocation6 + $0x730] sm:$0xff] %v547_v21  ;;  %v553_v33 = vmul.f32 %v999_v0, %v264_v30  ;;  %v266_v35 = vld [vmem:[#allocation3 + $0x770] sm:$0xff]  ;;  %v267_v36 = vld [vmem:[#allocation3 + $0x778] sm:$0xff]  ;;  %836 = vst [vmem:[#allocation6 + $0x738] sm:$0xff] %v548_v25  ;;  %v554_v37 = vmul.f32 %v999_v0, %v265_v34 }
  0x8a   :  { %837 = vst [vmem:[#allocation6 + $0x740] sm:$0xff] %v549_v26  ;;  %838 = vst [vmem:[#allocation6 + $0x748] sm:$0xff] %v550_v27  ;;  %v555_v38 = vmul.f32 %v999_v0, %v266_v35  ;;  %v556_v39 = vmul.f32 %v999_v0, %v267_v36  ;;  %v268_v40 = vld [vmem:[#allocation3 + $0x780] sm:$0xff]  ;;  %v269_v41 = vld [vmem:[#allocation3 + $0x788] sm:$0xff] }
  0x8b   :  { %v270_v42 = vld [vmem:[#allocation3 + $0x790] sm:$0xff]  ;;  %839 = vst [vmem:[#allocation6 + $0x750] sm:$0xff] %v551_v31  ;;  %840 = vst [vmem:[#allocation6 + $0x758] sm:$0xff] %v552_v32  ;;  %v557_v43 = vmul.f32 %v999_v0, %v268_v40  ;;  %v558_v44 = vmul.f32 %v999_v0, %v269_v41  ;;  %v271_v46 = vld [vmem:[#allocation3 + $0x798] sm:$0xff] }
  0x8c   :  { %841 = vst [vmem:[#allocation6 + $0x760] sm:$0xff] %v553_v33  ;;  %v559_v45 = vmul.f32 %v999_v0, %v270_v42  ;;  %v272_v47 = vld [vmem:[#allocation3 + $0x7a0] sm:$0xff]  ;;  %v273_v48 = vld [vmem:[#allocation3 + $0x7a8] sm:$0xff]  ;;  %842 = vst [vmem:[#allocation6 + $0x768] sm:$0xff] %v554_v37  ;;  %v560_v49 = vmul.f32 %v999_v0, %v271_v46 }
  0x8d   :  { %843 = vst [vmem:[#allocation6 + $0x770] sm:$0xff] %v555_v38  ;;  %844 = vst [vmem:[#allocation6 + $0x778] sm:$0xff] %v556_v39  ;;  %v561_v50 = vmul.f32 %v999_v0, %v272_v47  ;;  %v562_v51 = vmul.f32 %v999_v0, %v273_v48  ;;  %v274_v52 = vld [vmem:[#allocation3 + $0x7b0] sm:$0xff]  ;;  %v275_v53 = vld [vmem:[#allocation3 + $0x7b8] sm:$0xff] }
  0x8e   :  { %v276_v54 = vld [vmem:[#allocation3 + $0x7c0] sm:$0xff]  ;;  %845 = vst [vmem:[#allocation6 + $0x780] sm:$0xff] %v557_v43  ;;  %846 = vst [vmem:[#allocation6 + $0x788] sm:$0xff] %v558_v44  ;;  %v563_v55 = vmul.f32 %v999_v0, %v274_v52  ;;  %v564_v56 = vmul.f32 %v999_v0, %v275_v53  ;;  %v277_v58 = vld [vmem:[#allocation3 + $0x7c8] sm:$0xff] }
  0x8f   :  { %847 = vst [vmem:[#allocation6 + $0x790] sm:$0xff] %v559_v45  ;;  %v565_v57 = vmul.f32 %v999_v0, %v276_v54  ;;  %v278_v59 = vld [vmem:[#allocation3 + $0x7d0] sm:$0xff]  ;;  %v279_v60 = vld [vmem:[#allocation3 + $0x7d8] sm:$0xff]  ;;  %848 = vst [vmem:[#allocation6 + $0x798] sm:$0xff] %v560_v49  ;;  %v566_v61 = vmul.f32 %v999_v0, %v277_v58 }
  0x90   :  { %849 = vst [vmem:[#allocation6 + $0x7a0] sm:$0xff] %v561_v50  ;;  %850 = vst [vmem:[#allocation6 + $0x7a8] sm:$0xff] %v562_v51  ;;  %v567_v62 = vmul.f32 %v999_v0, %v278_v59  ;;  %v568_v63 = vmul.f32 %v999_v0, %v279_v60  ;;  %v280_v1 = vld [vmem:[#allocation3 + $0x7e0] sm:$0xff]  ;;  %v281_v2 = vld [vmem:[#allocation3 + $0x7e8] sm:$0xff] }
  0x91   :  { %v282_v3 = vld [vmem:[#allocation3 + $0x7f0] sm:$0xff]  ;;  %851 = vst [vmem:[#allocation6 + $0x7b0] sm:$0xff] %v563_v55  ;;  %852 = vst [vmem:[#allocation6 + $0x7b8] sm:$0xff] %v564_v56  ;;  %v569_v4 = vmul.f32 %v999_v0, %v280_v1  ;;  %v570_v5 = vmul.f32 %v999_v0, %v281_v2  ;;  %v283_v7 = vld [vmem:[#allocation3 + $0x7f8] sm:$0xff] }
  0x92   :  { %853 = vst [vmem:[#allocation6 + $0x7c0] sm:$0xff] %v565_v57  ;;  %v571_v6 = vmul.f32 %v999_v0, %v282_v3  ;;  %v284_v8 = vld [vmem:[#allocation3 + $0x800] sm:$0xff]  ;;  %v285_v9 = vld [vmem:[#allocation3 + $0x808] sm:$0xff]  ;;  %854 = vst [vmem:[#allocation6 + $0x7c8] sm:$0xff] %v566_v61  ;;  %v572_v10 = vmul.f32 %v999_v0, %v283_v7 }
  0x93   :  { %855 = vst [vmem:[#allocation6 + $0x7d0] sm:$0xff] %v567_v62  ;;  %856 = vst [vmem:[#allocation6 + $0x7d8] sm:$0xff] %v568_v63  ;;  %v573_v11 = vmul.f32 %v999_v0, %v284_v8  ;;  %v574_v12 = vmul.f32 %v999_v0, %v285_v9  ;;  %v286_v13 = vld [vmem:[#allocation3 + $0x810] sm:$0xff]  ;;  %v287_v14 = vld [vmem:[#allocation3 + $0x818] sm:$0xff] }
  0x94   :  { %v288_v15 = vld [vmem:[#allocation3 + $0x820] sm:$0xff]  ;;  %857 = vst [vmem:[#allocation6 + $0x7e0] sm:$0xff] %v569_v4  ;;  %858 = vst [vmem:[#allocation6 + $0x7e8] sm:$0xff] %v570_v5  ;;  %v575_v16 = vmul.f32 %v999_v0, %v286_v13  ;;  %v576_v17 = vmul.f32 %v999_v0, %v287_v14  ;;  %v289_v19 = vld [vmem:[#allocation3 + $0x828] sm:$0xff] }
  0x95   :  { %859 = vst [vmem:[#allocation6 + $0x7f0] sm:$0xff] %v571_v6  ;;  %v577_v18 = vmul.f32 %v999_v0, %v288_v15  ;;  %v290_v20 = vld [vmem:[#allocation3 + $0x830] sm:$0xff]  ;;  %v291_v21 = vld [vmem:[#allocation3 + $0x838] sm:$0xff]  ;;  %860 = vst [vmem:[#allocation6 + $0x7f8] sm:$0xff] %v572_v10  ;;  %v578_v22 = vmul.f32 %v999_v0, %v289_v19 }
  0x96   :  { %861 = vst [vmem:[#allocation6 + $0x800] sm:$0xff] %v573_v11  ;;  %862 = vst [vmem:[#allocation6 + $0x808] sm:$0xff] %v574_v12  ;;  %v579_v23 = vmul.f32 %v999_v0, %v290_v20  ;;  %v580_v24 = vmul.f32 %v999_v0, %v291_v21  ;;  %v292_v25 = vld [vmem:[#allocation3 + $0x840] sm:$0xff]  ;;  %v293_v26 = vld [vmem:[#allocation3 + $0x848] sm:$0xff] }
  0x97   :  { %v294_v27 = vld [vmem:[#allocation3 + $0x850] sm:$0xff]  ;;  %863 = vst [vmem:[#allocation6 + $0x810] sm:$0xff] %v575_v16  ;;  %864 = vst [vmem:[#allocation6 + $0x818] sm:$0xff] %v576_v17  ;;  %v581_v28 = vmul.f32 %v999_v0, %v292_v25  ;;  %v582_v29 = vmul.f32 %v999_v0, %v293_v26  ;;  %v295_v31 = vld [vmem:[#allocation3 + $0x858] sm:$0xff] }
  0x98   :  { %865 = vst [vmem:[#allocation6 + $0x820] sm:$0xff] %v577_v18  ;;  %v583_v30 = vmul.f32 %v999_v0, %v294_v27  ;;  %v296_v32 = vld [vmem:[#allocation3 + $0x860] sm:$0xff]  ;;  %v297_v33 = vld [vmem:[#allocation3 + $0x868] sm:$0xff]  ;;  %866 = vst [vmem:[#allocation6 + $0x828] sm:$0xff] %v578_v22  ;;  %v584_v34 = vmul.f32 %v999_v0, %v295_v31 }
  0x99   :  { %867 = vst [vmem:[#allocation6 + $0x830] sm:$0xff] %v579_v23  ;;  %868 = vst [vmem:[#allocation6 + $0x838] sm:$0xff] %v580_v24  ;;  %v585_v35 = vmul.f32 %v999_v0, %v296_v32  ;;  %v586_v36 = vmul.f32 %v999_v0, %v297_v33  ;;  %v298_v37 = vld [vmem:[#allocation3 + $0x870] sm:$0xff]  ;;  %v299_v38 = vld [vmem:[#allocation3 + $0x878] sm:$0xff] }
  0x9a   :  { %v300_v39 = vld [vmem:[#allocation3 + $0x880] sm:$0xff]  ;;  %869 = vst [vmem:[#allocation6 + $0x840] sm:$0xff] %v581_v28  ;;  %870 = vst [vmem:[#allocation6 + $0x848] sm:$0xff] %v582_v29  ;;  %v587_v40 = vmul.f32 %v999_v0, %v298_v37  ;;  %v588_v41 = vmul.f32 %v999_v0, %v299_v38  ;;  %v301_v43 = vld [vmem:[#allocation3 + $0x888] sm:$0xff] }
  0x9b   :  { %871 = vst [vmem:[#allocation6 + $0x850] sm:$0xff] %v583_v30  ;;  %v589_v42 = vmul.f32 %v999_v0, %v300_v39  ;;  %v302_v44 = vld [vmem:[#allocation3 + $0x890] sm:$0xff]  ;;  %v303_v45 = vld [vmem:[#allocation3 + $0x898] sm:$0xff]  ;;  %872 = vst [vmem:[#allocation6 + $0x858] sm:$0xff] %v584_v34  ;;  %v590_v46 = vmul.f32 %v999_v0, %v301_v43 }
  0x9c   :  { %873 = vst [vmem:[#allocation6 + $0x860] sm:$0xff] %v585_v35  ;;  %874 = vst [vmem:[#allocation6 + $0x868] sm:$0xff] %v586_v36  ;;  %v591_v47 = vmul.f32 %v999_v0, %v302_v44  ;;  %v592_v48 = vmul.f32 %v999_v0, %v303_v45  ;;  %v304_v49 = vld [vmem:[#allocation3 + $0x8a0] sm:$0xff]  ;;  %v305_v50 = vld [vmem:[#allocation3 + $0x8a8] sm:$0xff] }
  0x9d   :  { %v306_v51 = vld [vmem:[#allocation3 + $0x8b0] sm:$0xff]  ;;  %875 = vst [vmem:[#allocation6 + $0x870] sm:$0xff] %v587_v40  ;;  %876 = vst [vmem:[#allocation6 + $0x878] sm:$0xff] %v588_v41  ;;  %v593_v52 = vmul.f32 %v999_v0, %v304_v49  ;;  %v594_v53 = vmul.f32 %v999_v0, %v305_v50  ;;  %v307_v55 = vld [vmem:[#allocation3 + $0x8b8] sm:$0xff] }
  0x9e   :  { %877 = vst [vmem:[#allocation6 + $0x880] sm:$0xff] %v589_v42  ;;  %v595_v54 = vmul.f32 %v999_v0, %v306_v51  ;;  %v308_v56 = vld [vmem:[#allocation3 + $0x8c0] sm:$0xff]  ;;  %v309_v57 = vld [vmem:[#allocation3 + $0x8c8] sm:$0xff]  ;;  %878 = vst [vmem:[#allocation6 + $0x888] sm:$0xff] %v590_v46  ;;  %v596_v58 = vmul.f32 %v999_v0, %v307_v55 }
  0x9f   :  { %879 = vst [vmem:[#allocation6 + $0x890] sm:$0xff] %v591_v47  ;;  %880 = vst [vmem:[#allocation6 + $0x898] sm:$0xff] %v592_v48  ;;  %v597_v59 = vmul.f32 %v999_v0, %v308_v56  ;;  %v598_v60 = vmul.f32 %v999_v0, %v309_v57  ;;  %v310_v61 = vld [vmem:[#allocation3 + $0x8d0] sm:$0xff]  ;;  %v311_v62 = vld [vmem:[#allocation3 + $0x8d8] sm:$0xff] }
  0xa0   :  { %v312_v63 = vld [vmem:[#allocation3 + $0x8e0] sm:$0xff]  ;;  %881 = vst [vmem:[#allocation6 + $0x8a0] sm:$0xff] %v593_v52  ;;  %882 = vst [vmem:[#allocation6 + $0x8a8] sm:$0xff] %v594_v53  ;;  %v599_v1 = vmul.f32 %v999_v0, %v310_v61  ;;  %v600_v2 = vmul.f32 %v999_v0, %v311_v62  ;;  %v313_v4 = vld [vmem:[#allocation3 + $0x8e8] sm:$0xff] }
  0xa1   :  { %883 = vst [vmem:[#allocation6 + $0x8b0] sm:$0xff] %v595_v54  ;;  %v601_v3 = vmul.f32 %v999_v0, %v312_v63  ;;  %v314_v5 = vld [vmem:[#allocation3 + $0x8f0] sm:$0xff]  ;;  %v315_v6 = vld [vmem:[#allocation3 + $0x8f8] sm:$0xff]  ;;  %884 = vst [vmem:[#allocation6 + $0x8b8] sm:$0xff] %v596_v58  ;;  %v602_v7 = vmul.f32 %v999_v0, %v313_v4 }
  0xa2   :  { %885 = vst [vmem:[#allocation6 + $0x8c0] sm:$0xff] %v597_v59  ;;  %886 = vst [vmem:[#allocation6 + $0x8c8] sm:$0xff] %v598_v60  ;;  %v603_v8 = vmul.f32 %v999_v0, %v314_v5  ;;  %v604_v9 = vmul.f32 %v999_v0, %v315_v6 }
  0xa3   :  { %887 = vst [vmem:[#allocation6 + $0x8d0] sm:$0xff] %v599_v1  ;;  %888 = vst [vmem:[#allocation6 + $0x8d8] sm:$0xff] %v600_v2 }
  0xa4   :  { %889 = vst [vmem:[#allocation6 + $0x8e0] sm:$0xff] %v601_v3  ;;  %890 = vst [vmem:[#allocation6 + $0x8e8] sm:$0xff] %v602_v7 }
  0xa5   :  { %891 = vst [vmem:[#allocation6 + $0x8f0] sm:$0xff] %v603_v8  ;;  %892 = vst [vmem:[#allocation6 + $0x8f8] sm:$0xff] %v604_v9 }
  0xa6   :  { %947 = shalt.err (!%p944_p12)
}
  0xa7   :  { %s948_s28 = scalar_lea.hbm %s1306_s2, 36864 }
  0xa8   :  { %p949_p13 = scmp.ne.s32.totalorder %s1306_s2, %s948_s28  ;;  %p952_p0 = scmp.lt.u32.totalorder %s948_s28, %s1306_s2 }
  0xaa   :  { %p954_p1 = pnand %p952_p0, %p949_p13 }
  0xac   :  { %957 = shalt.err (!%p954_p1)
}
  0xad   :  { %904 = dma.vmem_to_hbm [thread:$0]  %s899_s1, 36864, %s1306_s2, [#allocation5], %s963_s19, %s963_s19, %s964_s20  }
  0xae   :  { %960 = dma.done.wait [#allocation5], 36864  }
  0xaf   :  { %961 = vsyncadd [#allocation5], 4294930432 }
  0xb0   :  { %908 = vsyncpa [#allocation4], 1 }
  0xb1   :  { %909 = vsyncpa [#allocation5], 1 }

</bundles_post_ra>
